<compile_context>
chip_gen: v5e
topology: v5e:2x2
jax: 0.10.0
libtpu: 0.0.40
codegen_flags: <defaults>
</compile_context>

<pallas_src>
import math
import functools

import jax
import jax.numpy as jnp
from jax.experimental import pallas as pl
from jax.experimental.pallas import tpu as pltpu

_LANE = 128        # lane width (last dim)
_SUBLANE_F32 = 8   # f32 sublane tile
_TB_MAX = 256      # batch tile: multiple of 256 (v6e/v7x MXU) and 128 (v5e)


def _round_up(n, m):
    return ((n + m - 1) // m) * m


# ---------------------------------------------------------------------------
# Kernel body.  Refs = (x, w0, b0, ..., wL-1, bL-1, w_branch, b_branch, out).
# x/out are [TB, *] tiles; weights/biases are full (resident) arrays.
# ---------------------------------------------------------------------------
def _mlp_kernel(num_shared_layers, x_ref, *refs):
    out_ref = refs[-1]

    h = x_ref[...]                                   # [TB, in_pad] param dtype
    idx = 0
    for _ in range(num_shared_layers):
        w = refs[idx][...]                           # [in_pad, latent_pad] param dtype
        b = refs[idx + 1][...]                       # [1, latent_pad] f32
        idx += 2
        h32 = jnp.dot(h, w, preferred_element_type=jnp.float32) + b
        h = jnp.maximum(h32, 0.0).astype(w.dtype)    # carry activations in param dtype
    wb = refs[idx][...]                              # [latent_pad, total_out_pad]
    bb = refs[idx + 1][...]                          # [1, total_out_pad] f32
    out_ref[...] = jnp.dot(h, wb, preferred_element_type=jnp.float32) + bb


# ---------------------------------------------------------------------------
# One-time parameter packing: lane-pad every weight, concatenate branch
# linears into one matmul with per-branch 128-aligned column offsets.
# ---------------------------------------------------------------------------
def pack_params(shared_params, branch_params, output_dims, param_dtype=jnp.bfloat16):
    input_dim = shared_params[0][0].shape[0]
    latent = shared_params[-1][0].shape[1]
    in_pad = _round_up(input_dim, _LANE)
    latent_pad = _round_up(latent, _LANE)

    packed = []
    for li, (w, b) in enumerate(shared_params):
        in_dim, out_dim = w.shape
        row_pad = (in_pad if li == 0 else latent_pad) - in_dim
        col_pad = latent_pad - out_dim
        wp = jnp.pad(w.astype(jnp.float32), ((0, row_pad), (0, col_pad)))
        bp = jnp.pad(b.astype(jnp.float32), (0, col_pad)).reshape(1, -1)
        packed.append(wp.astype(param_dtype))
        packed.append(bp)                            # biases stay f32

    # Fused branch matmul, each branch's columns padded to a 128 multiple so
    # post-kernel per-branch slices start at lane-aligned offsets.
    sizes = [int(math.prod(d)) for d in output_dims]
    padded_sizes = [_round_up(n, _LANE) for n in sizes]
    offsets = []
    off = 0
    for p in padded_sizes:
        offsets.append(off)
        off += p
    total_out_pad = off

    wb_cols, bb_cols = [], []
    for (w, b), n, npad in zip(branch_params, sizes, padded_sizes):
        wb_cols.append(
            jnp.pad(w.astype(jnp.float32), ((0, latent_pad - latent), (0, npad - n)))
        )
        bb_cols.append(jnp.pad(b.astype(jnp.float32), (0, npad - n)))
    packed.append(jnp.concatenate(wb_cols, axis=1).astype(param_dtype))
    packed.append(jnp.concatenate(bb_cols, axis=0).reshape(1, -1))

    return packed, in_pad, total_out_pad, sizes, offsets


# ---------------------------------------------------------------------------
# Build a jitted forward closing over pre-packed weights.
# Accepts x of shape [input_dim] (module semantics) or [B, input_dim].
# ---------------------------------------------------------------------------
def build_forward(shared_params, branch_params, output_dims, param_dtype=jnp.bfloat16):
    packed, in_pad, total_out_pad, sizes, offsets = pack_params(
        shared_params, branch_params, output_dims, param_dtype
    )
    input_dim = shared_params[0][0].shape[0]
    num_shared = len(shared_params)
    kernel = functools.partial(_mlp_kernel, num_shared)

    itemsize = jnp.dtype(param_dtype).itemsize
    sublane = _SUBLANE_F32 * (4 // itemsize)         # 16 for bf16, 8 for f32
    param_bytes = sum(int(p.size) * p.dtype.itemsize for p in packed)
    # flops from UNpadded shapes (advisory cost estimate, no overcount).
    flops_per_row = 2 * (
        sum(int(w.shape[0]) * int(w.shape[1]) for (w, _) in shared_params)
        + sum(int(w.shape[0]) * int(w.shape[1]) for (w, _) in branch_params)
    )

    @jax.jit
    def forward(x):
        single = x.ndim == 1
        x2 = x.reshape(1, -1) if single else x
        B = x2.shape[0]

        B_pad = _round_up(max(B, sublane), sublane)
        if B_pad > _TB_MAX:
            B_pad = _round_up(B_pad, _TB_MAX)
            tb = _TB_MAX
        else:
            tb = B_pad
        n_tiles = B_pad // tb

        # Pad rows to the tile grid and lanes to 128; cast once to param dtype.
        x2 = jnp.pad(
            x2.astype(jnp.float32),
            ((0, B_pad - B), (0, in_pad - input_dim)),
        ).astype(param_dtype)

        cost = pl.CostEstimate(
            flops=int(B_pad * flops_per_row),
            transcendentals=0,
            bytes_accessed=int(x2.size) * itemsize
            + param_bytes
            + B_pad * total_out_pad * 4,
        )

        in_specs = [pl.BlockSpec((tb, in_pad), lambda i: (i, 0))] + [
            pl.BlockSpec(p.shape, lambda i: (0, 0)) for p in packed   # resident
        ]
        out_spec = pl.BlockSpec((tb, total_out_pad), lambda i: (i, 0))

        flat = pl.pallas_call(
            kernel,
            out_shape=jax.ShapeDtypeStruct((B_pad, total_out_pad), jnp.float32),
            grid=(n_tiles,),
            in_specs=in_specs,
            out_specs=out_spec,
            compiler_params=pltpu.CompilerParams(
                dimension_semantics=("parallel",),       # megacore on v7x
                vmem_limit_bytes=32 * 1024 * 1024,       # explicit, fits all chips
            ),
            cost_estimate=cost,
        )(x2, *packed)

        outputs = []
        for dims, n, off in zip(output_dims, sizes, offsets):
            chunk = flat[:B, off:off + n]                # off is 128-aligned
            if single:
                outputs.append(chunk.reshape(tuple(dims)))
            else:
                outputs.append(chunk.reshape((B,) + tuple(dims)))
        return outputs

    return forward


# ---------------------------------------------------------------------------
# Parameter init (PyTorch nn.Linear-style, weights stored transposed [in, out])
# ---------------------------------------------------------------------------
def init_params(key, input_dim, latent_dim, output_dims, num_shared_layers):
    shared_params, branch_params = [], []
    in_dim = input_dim
    for _ in range(num_shared_layers):
        key, kw, kb = jax.random.split(key, 3)
        bound = 1.0 / math.sqrt(in_dim)
        w = jax.random.uniform(kw, (in_dim, latent_dim), jnp.float32, -bound, bound)
        b = jax.random.uniform(kb, (latent_dim,), jnp.float32, -bound, bound)
        shared_params.append((w, b))
        in_dim = latent_dim
    for dims in output_dims:
        n = int(math.prod(dims))
        key, kw, kb = jax.random.split(key, 3)
        bound = 1.0 / math.sqrt(latent_dim)
        w = jax.random.uniform(kw, (latent_dim, n), jnp.float32, -bound, bound)
        b = jax.random.uniform(kb, (n,), jnp.float32, -bound, bound)
        branch_params.append((w, b))
    return shared_params, branch_params


def reference_flat(x, shared_params, branch_params):
    h = x
    for (w, b) in shared_params:
        h = jnp.maximum(h @ w + b, 0.0)
    return [h @ w + b for (w, b) in branch_params]


if __name__ == "__main__":
    # Small shapes consistent with the module's forward (flat x so that
    # .view(output_dim[i]) is well-defined).
    input_dim = 32
    latent_dim = 64                      # lane-padded to 128 inside pack_params
    output_dims = [(4, 16), (2, 8, 4)]   # per-branch output shapes (64 + 64)
    num_shared_layers = 2

    key = jax.random.PRNGKey(0)
    key, kx = jax.random.split(key)
    x = jax.random.normal(kx, (input_dim,), jnp.float32)

    shared_params, branch_params = init_params(
        key, input_dim, latent_dim, output_dims, num_shared_layers
    )

    fwd_bf16 = build_forward(shared_params, branch_params, output_dims,
                             param_dtype=jnp.bfloat16)
    fwd_f32 = build_forward(shared_params, branch_params, output_dims,
                            param_dtype=jnp.float32)

    # --- single-sample path (matches the PyTorch module semantics) ---
    flat_refs = reference_flat(x, shared_params, branch_params)

    outs = [jax.block_until_ready(o) for o in fwd_f32(x)]
    for o, r, dims in zip(outs, flat_refs, output_dims):
        assert o.shape == tuple(dims), (o.shape, dims)
        assert jnp.allclose(o.reshape(-1), r, atol=1e-5, rtol=1e-5), "mismatch (f32 single)"

    outs = [jax.block_until_ready(o) for o in fwd_bf16(x)]
    for o, r, dims in zip(outs, flat_refs, output_dims):
        assert o.shape == tuple(dims), (o.shape, dims)
        assert jnp.allclose(o.reshape(-1), r, atol=2e-2, rtol=2e-2), "mismatch (bf16 single)"

    # --- batched path (fills MXU rows, exercises the multi-tile grid) ---
    key, kb = jax.random.split(key)
    B = 300                                            # pads to 512 -> 2 grid tiles of 256
    xb = jax.random.normal(kb, (B, input_dim), jnp.float32)
    flat_refs_b = reference_flat(xb, shared_params, branch_params)

    outs_b = [jax.block_until_ready(o) for o in fwd_bf16(xb)]
    for o, r, dims in zip(outs_b, flat_refs_b, output_dims):
        assert o.shape == (B,) + tuple(dims), (o.shape, dims)
        assert jnp.allclose(o.reshape(B, -1), r, atol=2e-2, rtol=2e-2), "mismatch (bf16 batched)"

    outs_b = [jax.block_until_ready(o) for o in fwd_f32(xb)]
    for o, r, dims in zip(outs_b, flat_refs_b, output_dims):
        assert o.shape == (B,) + tuple(dims), (o.shape, dims)
        assert jnp.allclose(o.reshape(B, -1), r, atol=1e-5, rtol=1e-5), "mismatch (f32 batched)"

    print("KERNEL_OK")
</pallas_src>

<mosaic_0001>
module attributes {stable_mosaic.version = 11 : i64} {
  func.func @_mlp_kernel(%arg0: i32, %arg1: memref<8x128xf32, #tpu.memory_space<vmem>>, %arg2: memref<128x128xf32, #tpu.memory_space<vmem>>, %arg3: memref<1x128xf32, #tpu.memory_space<vmem>>, %arg4: memref<128x128xf32, #tpu.memory_space<vmem>>, %arg5: memref<1x128xf32, #tpu.memory_space<vmem>>, %arg6: memref<128x256xf32, #tpu.memory_space<vmem>>, %arg7: memref<1x256xf32, #tpu.memory_space<vmem>>, %arg8: memref<8x256xf32, #tpu.memory_space<vmem>>) attributes {dimension_semantics = [#tpu.dimension_semantics<parallel>], iteration_bounds = array<i64: 1>, scalar_prefetch = 0 : i64, scratch_operands = 0 : i64, tpu.core_type = #tpu.core_type<tc>, window_params = [{transform_indices = @transform_0, window_bounds = array<i64: 8, 128>}, {pipeline_mode = #tpu.pipeline_mode<synchronous>, transform_indices = @transform_1, window_bounds = array<i64: 128, 128>}, {pipeline_mode = #tpu.pipeline_mode<synchronous>, transform_indices = @transform_2, window_bounds = array<i64: 1, 128>}, {pipeline_mode = #tpu.pipeline_mode<synchronous>, transform_indices = @transform_3, window_bounds = array<i64: 128, 128>}, {pipeline_mode = #tpu.pipeline_mode<synchronous>, transform_indices = @transform_4, window_bounds = array<i64: 1, 128>}, {pipeline_mode = #tpu.pipeline_mode<synchronous>, transform_indices = @transform_5, window_bounds = array<i64: 128, 256>}, {pipeline_mode = #tpu.pipeline_mode<synchronous>, transform_indices = @transform_6, window_bounds = array<i64: 1, 256>}, {transform_indices = @transform_7, window_bounds = array<i64: 8, 256>}]} {
    %c0 = arith.constant 0 : index
    %c0_0 = arith.constant 0 : index
    %0 = vector.load %arg1[%c0, %c0_0] : memref<8x128xf32, #tpu.memory_space<vmem>>, vector<8x128xf32>
    %c0_1 = arith.constant 0 : index
    %c0_2 = arith.constant 0 : index
    %1 = vector.load %arg2[%c0_1, %c0_2] : memref<128x128xf32, #tpu.memory_space<vmem>>, vector<128x128xf32>
    %c0_3 = arith.constant 0 : index
    %c0_4 = arith.constant 0 : index
    %2 = vector.load %arg3[%c0_3, %c0_4] : memref<1x128xf32, #tpu.memory_space<vmem>>, vector<1x128xf32>
    %cst = arith.constant dense<0.000000e+00> : vector<8x128xf32>
    %3 = tpu.matmul %0, %1, %cst {dimension_numbers = #tpu.dot_dimension_numbers<[1], [0], [0], [1], [0, 0, 1, 1], [], []>} : vector<8x128xf32>, vector<128x128xf32>, vector<8x128xf32> -> vector<8x128xf32>
    %4 = vector.broadcast %2 : vector<1x128xf32> to vector<8x128xf32>
    %5 = arith.addf %3, %4 : vector<8x128xf32>
    %cst_5 = arith.constant 0.000000e+00 : f32
    %6 = vector.broadcast %cst_5 : f32 to vector<8x128xf32>
    %7 = arith.maximumf %5, %6 : vector<8x128xf32>
    %c0_6 = arith.constant 0 : index
    %c0_7 = arith.constant 0 : index
    %8 = vector.load %arg4[%c0_6, %c0_7] : memref<128x128xf32, #tpu.memory_space<vmem>>, vector<128x128xf32>
    %c0_8 = arith.constant 0 : index
    %c0_9 = arith.constant 0 : index
    %9 = vector.load %arg5[%c0_8, %c0_9] : memref<1x128xf32, #tpu.memory_space<vmem>>, vector<1x128xf32>
    %cst_10 = arith.constant dense<0.000000e+00> : vector<8x128xf32>
    %10 = tpu.matmul %7, %8, %cst_10 {dimension_numbers = #tpu.dot_dimension_numbers<[1], [0], [0], [1], [0, 0, 1, 1], [], []>} : vector<8x128xf32>, vector<128x128xf32>, vector<8x128xf32> -> vector<8x128xf32>
    %11 = vector.broadcast %9 : vector<1x128xf32> to vector<8x128xf32>
    %12 = arith.addf %10, %11 : vector<8x128xf32>
    %cst_11 = arith.constant 0.000000e+00 : f32
    %13 = vector.broadcast %cst_11 : f32 to vector<8x128xf32>
    %14 = arith.maximumf %12, %13 : vector<8x128xf32>
    %c0_12 = arith.constant 0 : index
    %c0_13 = arith.constant 0 : index
    %15 = vector.load %arg6[%c0_12, %c0_13] : memref<128x256xf32, #tpu.memory_space<vmem>>, vector<128x256xf32>
    %c0_14 = arith.constant 0 : index
    %c0_15 = arith.constant 0 : index
    %16 = vector.load %arg7[%c0_14, %c0_15] : memref<1x256xf32, #tpu.memory_space<vmem>>, vector<1x256xf32>
    %cst_16 = arith.constant dense<0.000000e+00> : vector<8x256xf32>
    %17 = tpu.matmul %14, %15, %cst_16 {dimension_numbers = #tpu.dot_dimension_numbers<[1], [0], [0], [1], [0, 0, 1, 1], [], []>} : vector<8x128xf32>, vector<128x256xf32>, vector<8x256xf32> -> vector<8x256xf32>
    %18 = vector.broadcast %16 : vector<1x256xf32> to vector<8x256xf32>
    %19 = arith.addf %17, %18 : vector<8x256xf32>
    %c0_17 = arith.constant 0 : index
    %c0_18 = arith.constant 0 : index
    %20 = vector.load %arg8[%c0_17, %c0_18] : memref<8x256xf32, #tpu.memory_space<vmem>>, vector<8x256xf32>
    tpu.vector_store %arg8[%c0_17, %c0_18], %19 {strides = array<i32>} : memref<8x256xf32, #tpu.memory_space<vmem>>, vector<8x256xf32>,
    return
  }
  func.func @transform_0(%arg0: i32) -> (i32, i32) {
    %c0_i32 = arith.constant 0 : i32
    %c0_i32_0 = arith.constant 0 : i32
    return %arg0, %c0_i32 : i32, i32
  }
  func.func @transform_1(%arg0: i32) -> (i32, i32) {
    %c0_i32 = arith.constant 0 : i32
    %c0_i32_0 = arith.constant 0 : i32
    %c0_i32_1 = arith.constant 0 : i32
    return %c0_i32, %c0_i32_0 : i32, i32
  }
  func.func @transform_2(%arg0: i32) -> (i32, i32) {
    %c0_i32 = arith.constant 0 : i32
    %c0_i32_0 = arith.constant 0 : i32
    %c0_i32_1 = arith.constant 0 : i32
    return %c0_i32, %c0_i32_0 : i32, i32
  }
  func.func @transform_3(%arg0: i32) -> (i32, i32) {
    %c0_i32 = arith.constant 0 : i32
    %c0_i32_0 = arith.constant 0 : i32
    %c0_i32_1 = arith.constant 0 : i32
    return %c0_i32, %c0_i32_0 : i32, i32
  }
  func.func @transform_4(%arg0: i32) -> (i32, i32) {
    %c0_i32 = arith.constant 0 : i32
    %c0_i32_0 = arith.constant 0 : i32
    %c0_i32_1 = arith.constant 0 : i32
    return %c0_i32, %c0_i32_0 : i32, i32
  }
  func.func @transform_5(%arg0: i32) -> (i32, i32) {
    %c0_i32 = arith.constant 0 : i32
    %c0_i32_0 = arith.constant 0 : i32
    %c0_i32_1 = arith.constant 0 : i32
    return %c0_i32, %c0_i32_0 : i32, i32
  }
  func.func @transform_6(%arg0: i32) -> (i32, i32) {
    %c0_i32 = arith.constant 0 : i32
    %c0_i32_0 = arith.constant 0 : i32
    %c0_i32_1 = arith.constant 0 : i32
    return %c0_i32, %c0_i32_0 : i32, i32
  }
  func.func @transform_7(%arg0: i32) -> (i32, i32) {
    %c0_i32 = arith.constant 0 : i32
    %c0_i32_0 = arith.constant 0 : i32
    return %arg0, %c0_i32 : i32, i32
  }
}

</mosaic_0001>

<bundles_post_ra>
// kernel: forward.1
= control target key start
LH: loop header
LB: loop body
LE: loop exit
PB: predicated region body
PF: predicated region fallthrough
CT: control target
= control target key end

     0   :  { %12 = vsyncpa [#allocation3], 0  ;;  %s401_s0 = inlined_call_operand.vmem [shape: f32[8,128], index: 0, kind: input, shape index: {}]   ;;  %s402_s1 = inlined_call_operand.hbm [shape: f32[128,128], index: 1, kind: input, shape index: {}]   ;;  %s403_s2 = inlined_call_operand.vmem [shape: f32[1,128], index: 2, kind: input, shape index: {}]   ;;  %s404_s3 = inlined_call_operand.hbm [shape: f32[128,128], index: 3, kind: input, shape index: {}]   ;;  %s405_s4 = inlined_call_operand.vmem [shape: f32[1,128], index: 4, kind: input, shape index: {}]   ;;  %s406_s5 = inlined_call_operand.hbm [shape: f32[128,256], index: 5, kind: input, shape index: {}]   ;;  %s407_s6 = inlined_call_operand.vmem [shape: f32[1,256], index: 6, kind: input, shape index: {}]   ;;  %s408_s7 = inlined_call_operand.vmem [shape: f32[8,256], index: 7, kind: output, shape index: {}]  }
   0x1   :  { %13 = vsyncpa [#allocation5], 0  ;;  %s35_s26 = sshll.u32 %s404_s3, 4  ;;  %s327_s27 = smov [#allocation4]   ;;  %s36_s26 = int_to_ptr.hbm [resolvable:$true] %s35_s26 }
   0x2   :  { %s37_s28 = sshll.u32 %s327_s27, 4  ;;  %s20_s8 = sshll.u32 %s402_s1, 4  ;;  %s38_s28 = int_to_ptr.vmem [resolvable:$true] %s37_s28  ;;  %s21_s8 = int_to_ptr.hbm [resolvable:$true] %s20_s8 }
   0x3   :  { %s328_s9 = smov 128   ;;  %s329_s10 = smov 8  }
   0x4   :  { %43 = dma.hbm_to_vmem [thread:$0]  %s36_s26, 2048, %s38_s28, [#allocation5], %s328_s9, %s328_s9, %s329_s10  }
   0x5   :  { %s330_s11 = smov [#allocation2]   ;;  %s50_s15 = sshll.u32 %s406_s5, 4  ;;  %s51_s15 = int_to_ptr.hbm [resolvable:$true] %s50_s15 }
   0x6   :  { %s22_s12 = sshll.u32 %s330_s11, 4  ;;  %s331_s3 = smov [#allocation6]   ;;  %s23_s12 = int_to_ptr.vmem [resolvable:$true] %s22_s12 }
   0x7   :  { %28 = dma.hbm_to_vmem [thread:$0]  %s21_s8, 2048, %s23_s12, [#allocation3], %s328_s9, %s328_s9, %s329_s10  }
   0x8   :  { %s52_s16 = sshll.u32 %s331_s3, 4  ;;  %s332_s17 = smov 256   ;;  %s53_s16 = int_to_ptr.vmem [resolvable:$true] %s52_s16 }
   0x9   :  { %s333_s18 = smov 16  }
   0xa   :  { %58 = dma.hbm_to_vmem [thread:$0]  %s51_s15, 4096, %s53_s16, [#allocation5], %s332_s17, %s332_s17, %s333_s18  }
   0xb   :  { %323 = dma.done.wait [#allocation3], 2048  }
   0xc   :  { %324 = vsyncadd [#allocation3], 4294965248 }
   0xd   :  { %325 = dma.done.wait [#allocation5], 6144  }
   0xe   :  { %326 = vsyncadd [#allocation5], 4294961152  ;;  %v89_v0 = vld [vmem:[#allocation2 + $0x78] sm:$0xff]  ;;  %v88_v1 = vld [vmem:[#allocation2 + $0x70] sm:$0xff] }
   0xf   :  { %94 = vmatpush.msra.mxu0 %v89_v0  ;;  %v87_v2 = vld [vmem:[#allocation2 + $0x68] sm:$0xff]  ;;  %v86_v3 = vld [vmem:[#allocation2 + $0x60] sm:$0xff]  ;;  %v130_v4 = vld [vmem:[#allocation4 + $0x78] sm:$0xff] }
  0x10   :  { %v85_v5 = vld [vmem:[#allocation2 + $0x58] sm:$0xff]  ;;  %135 = vmatpush.msra.mxu1 %v130_v4  ;;  %v129_v6 = vld [vmem:[#allocation4 + $0x70] sm:$0xff]  ;;  %v128_v7 = vld [vmem:[#allocation4 + $0x68] sm:$0xff] }
  0x11   :  { %95 = vmatpush.msra.mxu0 %v88_v1  ;;  %v84_v8 = vld [vmem:[#allocation2 + $0x50] sm:$0xff]  ;;  %v127_v9 = vld [vmem:[#allocation4 + $0x60] sm:$0xff]  ;;  %v83_v10 = vld [vmem:[#allocation2 + $0x48] sm:$0xff] }
  0x12   :  { %136 = vmatpush.msra.mxu1 %v129_v6  ;;  %v126_v11 = vld [vmem:[#allocation4 + $0x58] sm:$0xff]  ;;  %v82_v12 = vld [vmem:[#allocation2 + $0x40] sm:$0xff]  ;;  %v125_v13 = vld [vmem:[#allocation4 + $0x50] sm:$0xff] }
  0x13   :  { %96 = vmatpush.msra.mxu0 %v87_v2  ;;  %v81_v14 = vld [vmem:[#allocation2 + $0x38] sm:$0xff]  ;;  %v124_v15 = vld [vmem:[#allocation4 + $0x48] sm:$0xff]  ;;  %v80_v16 = vld [vmem:[#allocation2 + $0x30] sm:$0xff] }
  0x14   :  { %137 = vmatpush.msra.mxu1 %v128_v7  ;;  %v123_v17 = vld [vmem:[#allocation4 + $0x40] sm:$0xff]  ;;  %v79_v18 = vld [vmem:[#allocation2 + $0x28] sm:$0xff]  ;;  %v122_v19 = vld [vmem:[#allocation4 + $0x38] sm:$0xff] }
  0x15   :  { %97 = vmatpush.msra.mxu0 %v86_v3  ;;  %v78_v20 = vld [vmem:[#allocation2 + $0x20] sm:$0xff]  ;;  %v121_v21 = vld [vmem:[#allocation4 + $0x30] sm:$0xff]  ;;  %v77_v22 = vld [vmem:[#allocation2 + $0x18] sm:$0xff] }
  0x16   :  { %138 = vmatpush.msra.mxu1 %v127_v9  ;;  %v120_v23 = vld [vmem:[#allocation4 + $0x28] sm:$0xff]  ;;  %v76_v24 = vld [vmem:[#allocation2 + $0x10] sm:$0xff]  ;;  %v119_v25 = vld [vmem:[#allocation4 + $0x20] sm:$0xff] }
  0x17   :  { %98 = vmatpush.msra.mxu0 %v85_v5  ;;  %v75_v26 = vld [vmem:[#allocation2 + $0x8] sm:$0xff]  ;;  %v118_v27 = vld [vmem:[#allocation4 + $0x18] sm:$0xff]  ;;  %v74_v28 = vld [vmem:[#allocation2] sm:$0xff] }
  0x18   :  { %139 = vmatpush.msra.mxu1 %v126_v11  ;;  %v73_v29 = vld [vmem:[%s401_s0] sm:$0xff]  ;;  %v117_v30 = vld [vmem:[#allocation4 + $0x10] sm:$0xff]  ;;  %v116_v31 = vld [vmem:[#allocation4 + $0x8] sm:$0xff] }
  0x19   :  { %99 = vmatpush.msra.mxu0 %v84_v8  ;;  %v115_v32 = vld [vmem:[#allocation4] sm:$0xff]  ;;  %v186_v33 = vld [vmem:[#allocation6 + $0xf0] sm:$0xff]  ;;  %v187_v34 = vld [vmem:[#allocation6 + $0xf8] sm:$0xff] }
  0x1a   :  { %140 = vmatpush.msra.mxu1 %v125_v13  ;;  %v184_v35 = vld [vmem:[#allocation6 + $0xe0] sm:$0xff]  ;;  %194 = vmatpush.msra.mxu2 %v186_v33  ;;  %v185_v36 = vld [vmem:[#allocation6 + $0xe8] sm:$0xff]  ;;  %v182_v37 = vld [vmem:[#allocation6 + $0xd0] sm:$0xff] }
  0x1b   :  { %100 = vmatpush.msra.mxu0 %v83_v10  ;;  %214 = vmatpush.msra.mxu3 %v187_v34  ;;  %v183_v38 = vld [vmem:[#allocation6 + $0xd8] sm:$0xff]  ;;  %v180_v39 = vld [vmem:[#allocation6 + $0xc0] sm:$0xff]  ;;  %v181_v40 = vld [vmem:[#allocation6 + $0xc8] sm:$0xff] }
  0x1c   :  { %141 = vmatpush.msra.mxu1 %v124_v15  ;;  %195 = vmatpush.msra.mxu2 %v184_v35  ;;  %v178_v41 = vld [vmem:[#allocation6 + $0xb0] sm:$0xff]  ;;  %v179_v42 = vld [vmem:[#allocation6 + $0xb8] sm:$0xff]  ;;  %v176_v43 = vld [vmem:[#allocation6 + $0xa0] sm:$0xff] }
  0x1d   :  { %101 = vmatpush.msra.mxu0 %v82_v12  ;;  %215 = vmatpush.msra.mxu3 %v185_v36  ;;  %v177_v44 = vld [vmem:[#allocation6 + $0xa8] sm:$0xff]  ;;  %v174_v45 = vld [vmem:[#allocation6 + $0x90] sm:$0xff]  ;;  %v175_v46 = vld [vmem:[#allocation6 + $0x98] sm:$0xff] }
  0x1e   :  { %142 = vmatpush.msra.mxu1 %v123_v17  ;;  %196 = vmatpush.msra.mxu2 %v182_v37  ;;  %v172_v47 = vld [vmem:[#allocation6 + $0x80] sm:$0xff]  ;;  %v173_v48 = vld [vmem:[#allocation6 + $0x88] sm:$0xff]  ;;  %v170_v49 = vld [vmem:[#allocation6 + $0x70] sm:$0xff] }
  0x1f   :  { %102 = vmatpush.msra.mxu0 %v81_v14  ;;  %216 = vmatpush.msra.mxu3 %v183_v38  ;;  %v171_v50 = vld [vmem:[#allocation6 + $0x78] sm:$0xff]  ;;  %v168_v51 = vld [vmem:[#allocation6 + $0x60] sm:$0xff]  ;;  %v169_v52 = vld [vmem:[#allocation6 + $0x68] sm:$0xff] }
  0x20   :  { %143 = vmatpush.msra.mxu1 %v122_v19  ;;  %197 = vmatpush.msra.mxu2 %v180_v39  ;;  %v166_v53 = vld [vmem:[#allocation6 + $0x50] sm:$0xff]  ;;  %v167_v54 = vld [vmem:[#allocation6 + $0x58] sm:$0xff]  ;;  %v164_v55 = vld [vmem:[#allocation6 + $0x40] sm:$0xff] }
  0x21   :  { %103 = vmatpush.msra.mxu0 %v80_v16  ;;  %217 = vmatpush.msra.mxu3 %v181_v40  ;;  %v165_v56 = vld [vmem:[#allocation6 + $0x48] sm:$0xff]  ;;  %v162_v57 = vld [vmem:[#allocation6 + $0x30] sm:$0xff]  ;;  %v163_v58 = vld [vmem:[#allocation6 + $0x38] sm:$0xff] }
  0x22   :  { %144 = vmatpush.msra.mxu1 %v121_v21  ;;  %198 = vmatpush.msra.mxu2 %v178_v41  ;;  %v249_v59 = vld [vmem:[%s403_s2] ss:$0 sm:$0xff]  ;;  %v161_v0 = vld [vmem:[#allocation6 + $0x28] sm:$0xff]  ;;  %v158_v1 = vld [vmem:[#allocation6 + $0x10] sm:$0xff] }
  0x23   :  { %104 = vmatpush.msra.mxu0 %v79_v18  ;;  %218 = vmatpush.msra.mxu3 %v179_v42  ;;  %v160_v63 = vld [vmem:[#allocation6 + $0x20] sm:$0xff]  ;;  %v159_v2 = vld [vmem:[#allocation6 + $0x18] sm:$0xff]  ;;  %v157_v4 = vld [vmem:[#allocation6 + $0x8] sm:$0xff] }
  0x24   :  { %145 = vmatpush.msra.mxu1 %v120_v23  ;;  %199 = vmatpush.msra.mxu2 %v176_v43  ;;  %v156_v3 = vld [vmem:[#allocation6] sm:$0xff] }
  0x25   :  { %105 = vmatpush.msra.mxu0 %v78_v20  ;;  %219 = vmatpush.msra.mxu3 %v177_v44  ;;  %v250_v5 = vld [vmem:[%s405_s4] ss:$0 sm:$0xff] }
  0x26   :  { %146 = vmatpush.msra.mxu1 %v119_v25  ;;  %200 = vmatpush.msra.mxu2 %v174_v45  ;;  %v188_v9 = vld [vmem:[%s407_s6] sm:$0x3] }
  0x27   :  { %106 = vmatpush.msra.mxu0 %v77_v22  ;;  %220 = vmatpush.msra.mxu3 %v175_v46  ;;  %v190_v10 = vperm.slane %v188_v9, 0  ;;  %v191_v11 = vperm.slane %v188_v9, 1 }
  0x28   :  { %147 = vmatpush.msra.mxu1 %v118_v27  ;;  %201 = vmatpush.msra.mxu2 %v172_v47 }
  0x29   :  { %107 = vmatpush.msra.mxu0 %v76_v24  ;;  %221 = vmatpush.msra.mxu3 %v173_v48 }
  0x2a   :  { %148 = vmatpush.msra.mxu1 %v117_v30  ;;  %202 = vmatpush.msra.mxu2 %v170_v49 }
  0x2b   :  { %108 = vmatpush.msra.mxu0 %v75_v26  ;;  %222 = vmatpush.msra.mxu3 %v171_v50 }
  0x2c   :  { %149 = vmatpush.msra.mxu1 %v116_v31  ;;  %203 = vmatpush.msra.mxu2 %v168_v51 }
  0x2d   :  { %109 = vmatpush.msra.mxu0 %v74_v28  ;;  %223 = vmatpush.msra.mxu3 %v169_v52 }
  0x2e   :  { %110 = vmatmul.f32.vlgmr.msra.gmra.mxu0 %v73_v29  ;;  %150 = vmatpush.msra.mxu1 %v115_v32 }
  0x2f   :  { %204 = vmatpush.msra.mxu2 %v166_v53  ;;  %224 = vmatpush.msra.mxu3 %v167_v54 }
  0x31   :  { %205 = vmatpush.msra.mxu2 %v164_v55  ;;  %225 = vmatpush.msra.mxu3 %v165_v56 }
  0x33   :  { %206 = vmatpush.msra.mxu2 %v162_v57  ;;  %226 = vmatpush.msra.mxu3 %v163_v58 }
  0x35   :  { %207 = vmatpush.msra.mxu2 %v160_v63  ;;  %227 = vmatpush.msra.mxu3 %v161_v0 }
  0x37   :  { %208 = vmatpush.msra.mxu2 %v158_v1  ;;  %228 = vmatpush.msra.mxu3 %v159_v2 }
  0x39   :  { %209 = vmatpush.msra.mxu2 %v156_v3  ;;  %229 = vmatpush.msra.mxu3 %v157_v4 }
  0xab   :  { %v111_v60 = vpop.f32.mrf.mxu0 }
  0xac   :  { %v112_v61 = vadd.f32 %v249_v59, %v111_v60 }
  0xae   :  { %v114_v62 = vmax.f32 %v112_v61, 0.0 }
  0xb0   :  { %151 = vmatmul.f32.vlgmr.msra.gmra.mxu1 %v114_v62 }
 0x12d   :  { %v152_v6 = vpop.f32.mrf.mxu1 }
 0x12e   :  { %v153_v7 = vadd.f32 %v250_v5, %v152_v6 }
 0x130   :  { %v155_v8 = vmax.f32 %v153_v7, 0.0 }
 0x132   :  { %210 = vmatmul.f32.vlgmr.msra.gmra.mxu2 %v155_v8  ;;  %230 = vmatmul.f32.vlgmr.msra.gmra.mxu3 %v155_v8 }
 0x1b5   :  { %v211_v12 = vpop.f32.mrf.mxu2  ;;  %v231_v13 = vpop.f32.mrf.mxu3 }
 0x1b6   :  { %v212_v14 = vadd.f32 %v211_v12, %v190_v10  ;;  %v232_v15 = vadd.f32 %v231_v13, %v191_v11 }
 0x1b8   :  { %234 = vst [vmem:[%s408_s7] sm:$0xff] %v212_v14 }
 0x1b9   :  { %235 = vst [vmem:[%s408_s7 + $0x8] sm:$0xff] %v232_v15 }
 0x1ba   :  { %240 = vsyncpa [#allocation3], 1 }
 0x1bb   :  { %241 = vsyncpa [#allocation5], 1 }

</bundles_post_ra>
